<compile_context>
chip_gen: v6e
topology: v6e:2x2x1
jax: 0.10.0
libtpu: 0.0.40
codegen_flags: <defaults>
</compile_context>

<pallas_src>
import functools

import jax
import jax.numpy as jnp
from jax.experimental import pallas as pl
from jax.experimental.pallas import tpu as pltpu


def _component_attention_kernel(qa_ref, ct_ref, w_ref, out_ref):
    # Per grid step (one batch row):
    #   qa_ref  : [1, 1,  F+1]   augmented query  [q_b, 1]
    #   ct_ref  : [1, F+1, Np]   augmented, transposed components
    #                            rows 0..F-1 = comp features, row F = log-mask bias
    #   w_ref   : [F+1, F+1]     [[Wq^T Wk, 0], [bq Wk, 1]]
    #   out_ref : [1, 1,  Np]    attention weights (lane-dense, Np % 128 == 0)
    qa = qa_ref[0]                                   # [1, F+1]
    w = w_ref[...]                                   # [F+1, F+1]
    ct = ct_ref[0]                                   # [F+1, Np]

    # q_eff = [q @ (Wq^T Wk) + bq Wk , 1]
    q_eff = jnp.dot(qa, w, preferred_element_type=jnp.float32)       # [1, F+1]
    # scores = q_eff[:F] . comp + 1 * log(mask + 1e-8)   (mask bias folded in)
    scores = jnp.dot(q_eff, ct, preferred_element_type=jnp.float32)  # [1, Np]

    # softmax over the (padded) component axis; padded slots score -1e30 -> 0.
    m = jnp.max(scores, axis=-1, keepdims=True)
    e = jnp.exp(scores - m)
    denom = jnp.sum(e, axis=-1, keepdims=True)
    out_ref[0] = (e * pl.reciprocal(denom, approx=False)).astype(out_ref.dtype)


@functools.partial(jax.jit, static_argnames=())
def component_attention(query_features, component_features, placed_mask,
                        wq, bq, wk, bk):
    B, F = query_features.shape
    _, N, _ = component_features.shape
    Fp = F + 1
    n_pad = ((N + 127) // 128) * 128  # lane-dense component axis

    f32 = jnp.float32
    q = query_features.astype(f32)
    comp = component_features.astype(f32)
    mask_bias = jnp.log(placed_mask.astype(f32) + 1e-8)              # [B, N]

    # --- fused projection weights (wrapper-side, tiny) ---------------------
    # scores[b,n] = q[b] @ (Wq^T Wk) @ comp[b,n]^T + (bq Wk) @ comp[b,n]^T
    #              + mask_bias[b,n] + const(b)
    # const(b) = (q Wq^T + bq) . bk is constant over n -> cancels in softmax,
    # so bk does not affect the output (kept in the signature for API parity).
    A = wq.astype(f32).T @ wk.astype(f32)                            # [F, F]
    c = bq.astype(f32) @ wk.astype(f32)                              # [F]
    del bk  # softmax-invariant contribution only

    w_aug = jnp.zeros((Fp, Fp), f32)
    w_aug = w_aug.at[:F, :F].set(A)
    w_aug = w_aug.at[F, :F].set(c)
    w_aug = w_aug.at[F, F].set(1.0)                                  # passes the
    # augmented "1" through so it multiplies the mask-bias feature row of comp.

    # --- augmented / pre-laid-out inputs (free XLA layout plumbing) --------
    q_aug = jnp.concatenate([q, jnp.ones((B, 1), f32)], axis=1)[:, None, :]  # [B,1,Fp]

    comp_plus = jnp.concatenate([comp, mask_bias[..., None]], axis=-1)       # [B,N,Fp]
    if n_pad != N:
        pad = jnp.concatenate(
            [jnp.zeros((B, n_pad - N, F), f32),
             jnp.full((B, n_pad - N, 1), -1e30, f32)], axis=-1)
        comp_plus = jnp.concatenate([comp_plus, pad], axis=1)                # [B,Np,Fp]
    comp_t = jnp.transpose(comp_plus, (0, 2, 1))                             # [B,Fp,Np]

    out = pl.pallas_call(
        _component_attention_kernel,
        out_shape=jax.ShapeDtypeStruct((B, 1, n_pad), f32),
        grid=(B,),
        in_specs=[
            pl.BlockSpec((1, 1, Fp), lambda b: (b, 0, 0)),      # q_aug
            pl.BlockSpec((1, Fp, n_pad), lambda b: (b, 0, 0)),  # comp_aug^T
            pl.BlockSpec((Fp, Fp), lambda b: (0, 0)),           # fused weights
        ],
        out_specs=pl.BlockSpec((1, 1, n_pad), lambda b: (b, 0, 0)),
        compiler_params=pltpu.CompilerParams(
            dimension_semantics=("parallel",)),
    )(q_aug, comp_t, w_aug)

    return out.reshape(B, n_pad)[:, :N]


def _reference(query_features, component_features, placed_mask, wq, bq, wk, bk):
    Q = query_features @ wq.T + bq                     # [B, F]
    K = component_features @ wk.T + bk                 # [B, N, F]
    scores = jnp.einsum('bf,bnf->bn', Q, K)
    scores = scores + jnp.log(placed_mask + 1e-8)
    return jax.nn.softmax(scores, axis=1)


if __name__ == "__main__":
    key = jax.random.PRNGKey(0)
    B, N, F = 2, 8, 32   # batch, num_components, feature_dim

    k1, k2, k3, k4, k5, k6, k7 = jax.random.split(key, 7)

    query_features = jax.random.normal(k1, (B, F), dtype=jnp.float32)
    component_features = jax.random.normal(k2, (B, N, F), dtype=jnp.float32)
    # binary placed mask (at least something placed)
    placed_mask = (jax.random.uniform(k3, (B, N)) > 0.5).astype(jnp.float32)
    placed_mask = placed_mask.at[:, 0].set(1.0)

    # deterministic parameter init (nn.Linear-style uniform)
    bound = 1.0 / (F ** 0.5)
    wq = jax.random.uniform(k4, (F, F), minval=-bound, maxval=bound, dtype=jnp.float32)
    bq = jax.random.uniform(k5, (F,), minval=-bound, maxval=bound, dtype=jnp.float32)
    wk = jax.random.uniform(k6, (F, F), minval=-bound, maxval=bound, dtype=jnp.float32)
    bk = jax.random.uniform(k7, (F,), minval=-bound, maxval=bound, dtype=jnp.float32)

    out = component_attention(query_features, component_features, placed_mask,
                              wq, bq, wk, bk)
    out = jax.block_until_ready(out)

    ref = _reference(query_features, component_features, placed_mask, wq, bq, wk, bk)
    assert out.shape == (B, N)
    assert jnp.allclose(out, ref, atol=1e-5, rtol=1e-5), "mismatch vs JAX reference"
    # attention weights sum to 1 over components
    assert jnp.allclose(jnp.sum(out, axis=1), jnp.ones((B,)), atol=1e-5)

    print("KERNEL_OK")
</pallas_src>

<mosaic_0001>
module attributes {stable_mosaic.version = 11 : i64} {
  func.func @_component_attention_kernel(%arg0: i32, %arg1: memref<1x1x33xf32, #tpu.memory_space<vmem>>, %arg2: memref<1x33x128xf32, #tpu.memory_space<vmem>>, %arg3: memref<33x33xf32, #tpu.memory_space<vmem>>, %arg4: memref<1x1x128xf32, #tpu.memory_space<vmem>>) attributes {dimension_semantics = [#tpu.dimension_semantics<parallel>], iteration_bounds = array<i64: 2>, scalar_prefetch = 0 : i64, scratch_operands = 0 : i64, tpu.core_type = #tpu.core_type<tc>, window_params = [{transform_indices = @transform_0, window_bounds = array<i64: 1, 1, 33>}, {transform_indices = @transform_1, window_bounds = array<i64: 1, 33, 128>}, {pipeline_mode = #tpu.pipeline_mode<synchronous>, transform_indices = @transform_2, window_bounds = array<i64: 33, 33>}, {transform_indices = @transform_3, window_bounds = array<i64: 1, 1, 128>}]} {
    %c0 = arith.constant 0 : index
    %c0_0 = arith.constant 0 : index
    %c0_1 = arith.constant 0 : index
    %0 = vector.load %arg1[%c0, %c0_0, %c0_1] : memref<1x1x33xf32, #tpu.memory_space<vmem>>, vector<1x1x33xf32>
    %1 = vector.shape_cast %0 : vector<1x1x33xf32> to vector<1x33xf32>
    %c0_2 = arith.constant 0 : index
    %c0_3 = arith.constant 0 : index
    %2 = vector.load %arg3[%c0_2, %c0_3] : memref<33x33xf32, #tpu.memory_space<vmem>>, vector<33x33xf32>
    %c0_4 = arith.constant 0 : index
    %c0_5 = arith.constant 0 : index
    %c0_6 = arith.constant 0 : index
    %3 = vector.load %arg2[%c0_4, %c0_5, %c0_6] : memref<1x33x128xf32, #tpu.memory_space<vmem>>, vector<1x33x128xf32>
    %4 = vector.shape_cast %3 : vector<1x33x128xf32> to vector<33x128xf32>
    %cst = arith.constant dense<0.000000e+00> : vector<1x33xf32>
    %5 = tpu.matmul %1, %2, %cst {dimension_numbers = #tpu.dot_dimension_numbers<[1], [0], [0], [1], [0, 0, 1, 1], [], []>} : vector<1x33xf32>, vector<33x33xf32>, vector<1x33xf32> -> vector<1x33xf32>
    %cst_7 = arith.constant dense<0.000000e+00> : vector<1x128xf32>
    %6 = tpu.matmul %5, %4, %cst_7 {dimension_numbers = #tpu.dot_dimension_numbers<[1], [0], [0], [1], [0, 0, 1, 1], [], []>} : vector<1x33xf32>, vector<33x128xf32>, vector<1x128xf32> -> vector<1x128xf32>
    %cst_8 = arith.constant dense<0xFF800000> : vector<1xf32>
    %7 = vector.multi_reduction <maximumf>, %6, %cst_8 [1] : vector<1x128xf32> to vector<1xf32>
    %8 = vector.shape_cast %7 : vector<1xf32> to vector<1x1xf32>
    %9 = vector.broadcast %8 : vector<1x1xf32> to vector<1x128xf32>
    %10 = arith.subf %6, %9 : vector<1x128xf32>
    %11 = math.exp %10 : vector<1x128xf32>
    %cst_9 = arith.constant dense<0.000000e+00> : vector<1xf32>
    %12 = vector.multi_reduction <add>, %11, %cst_9 [1] : vector<1x128xf32> to vector<1xf32>
    %13 = vector.shape_cast %12 : vector<1xf32> to vector<1x1xf32>
    %14 = tpu.reciprocal %13 : vector<1x1xf32> -> vector<1x1xf32>
    %15 = vector.broadcast %14 : vector<1x1xf32> to vector<1x128xf32>
    %16 = arith.mulf %11, %15 : vector<1x128xf32>
    %c0_10 = arith.constant 0 : index
    %c0_11 = arith.constant 0 : index
    %c0_12 = arith.constant 0 : index
    %17 = vector.load %arg4[%c0_10, %c0_11, %c0_12] : memref<1x1x128xf32, #tpu.memory_space<vmem>>, vector<1x1x128xf32>
    %18 = vector.shape_cast %17 : vector<1x1x128xf32> to vector<1x128xf32>
    %19 = vector.shape_cast %16 : vector<1x128xf32> to vector<1x1x128xf32>
    tpu.vector_store %arg4[%c0_10, %c0_11, %c0_12], %19 {strides = array<i32>} : memref<1x1x128xf32, #tpu.memory_space<vmem>>, vector<1x1x128xf32>,
    return
  }
  func.func @transform_0(%arg0: i32) -> (i32, i32, i32) {
    %c0_i32 = arith.constant 0 : i32
    %c0_i32_0 = arith.constant 0 : i32
    %c0_i32_1 = arith.constant 0 : i32
    return %arg0, %c0_i32, %c0_i32_0 : i32, i32, i32
  }
  func.func @transform_1(%arg0: i32) -> (i32, i32, i32) {
    %c0_i32 = arith.constant 0 : i32
    %c0_i32_0 = arith.constant 0 : i32
    %c0_i32_1 = arith.constant 0 : i32
    return %arg0, %c0_i32, %c0_i32_0 : i32, i32, i32
  }
  func.func @transform_2(%arg0: i32) -> (i32, i32) {
    %c0_i32 = arith.constant 0 : i32
    %c0_i32_0 = arith.constant 0 : i32
    %c0_i32_1 = arith.constant 0 : i32
    return %c0_i32, %c0_i32_0 : i32, i32
  }
  func.func @transform_3(%arg0: i32) -> (i32, i32, i32) {
    %c0_i32 = arith.constant 0 : i32
    %c0_i32_0 = arith.constant 0 : i32
    %c0_i32_1 = arith.constant 0 : i32
    return %arg0, %c0_i32, %c0_i32_0 : i32, i32, i32
  }
}

</mosaic_0001>

<bundles_post_ra>
// kernel: component_attention.1
= control target key start
LH: loop header
LB: loop body
LE: loop exit
PB: predicated region body
PF: predicated region fallthrough
CT: control target
= control target key end

     0   :  { %8 = vsyncpa [#allocation3], 0  ;;  %s728_s0 = inlined_call_operand.vmem [shape: f32[2,1,33], index: 0, kind: input, shape index: {}]   ;;  %s729_s1 = inlined_call_operand.vmem [shape: f32[2,33,128], index: 1, kind: input, shape index: {}]   ;;  %s730_s2 = inlined_call_operand.vmem [shape: f32[33,33], index: 2, kind: input, shape index: {}]   ;;  %s731_s3 = inlined_call_operand.hbm [shape: f32[2,1,128], index: 3, kind: output, shape index: {}]  }
   0x1   :  { %10 = vsyncpa [#allocation3 + $0x1], 0  ;;  %s617_s12 = smov 0   ;;  %s619_s13 = smov 0  }
   0x2   :  { %s621_s14 = smov 0   ;;  %s623_s15 = smov 0  }
   0x3 LB: > { %s638_s16 = sadd.s32 4294967295, %s592_s15   ;;  %s436_s17 = sadd.s32 4294967294, %s592_s15   ;;  %s592_s15 = sphi %s623_s15, %s737_s15   ;;  %s588_s14 = sphi %s621_s14, %s736_s14   ;;  %s584_s13 = sphi %s619_s13, %s735_s13   ;;  %s580_s12 = sphi %s617_s12, %s734_s12  }
   0x4   : > { %s642_s18 = sadd.s32 1, %s592_s15   ;;  %s96_s19 = sadd.s32 1, %s588_s14 }
   0x5   : > { %s93_s20 = ssub.s32 %s592_s15, %s642_s18  ;;  %p106_p0 = scmp.ne.s32.totalorder %s588_s14, %s584_s13 }
   0x6   : > { %p94_p1 = scmp.eq.s32.totalorder %s93_s20, 0  ;;  %p107_p2 = scmp.eq.s32.totalorder %s638_s16, 1 }
   0x7   : > { %p112_p3 = scmp.ne.s32.totalorder %s584_s13, %s580_s12  ;;  %p113_p4 = scmp.eq.s32.totalorder %s436_s17, 1 }
   0x8   : > { %s653_s21 = scalar_select %p94_p1, %s588_s14, %s96_s19  }
   0x9   : > { %p655_p5 = por %p107_p2, %p106_p0  ;;  %p659_p6 = por %p113_p4, %p112_p3 }
   0xa   : > { %p439_p7 = scmp.ge.s32.totalorder %s592_s15, 1  ;;  %p148_p8 = scmp.lt.s32.totalorder %s592_s15, 3 }
   0xc   : > { %p149_p9 = pnand %p439_p7, %p148_p8 }
   0xd   : > { %p174_p10 = scmp.lt.s32.totalorder (!%p149_p9), %s638_s16, 1  ;;  %s172_s24 = sand.u32 (!%p149_p9), 1, %s584_s13  }
   0xe   : > { %152 = sbr.rel (%p149_p9) target bundleno = 741 (0x2e5), region = 32  ;;  %s445_s25 = sshll.u32 (!%p149_p9), %s638_s16, 4 }
   0xf   : > { %s173_s26 = scalar_lea.vmem (!%p149_p9), [#allocation2], %s172_s24  ;;  %s360_s4 = scalar_lea.sflag (!%p149_p9), [#allocation3], %s172_s24 }
  0x10   : > { %s372_s27 = sshll.u32 (!%p149_p9), %s173_s26, 4  ;;  %s596_s6 = smov (!%p149_p9), [#allocation2]   ;;  %s373_s27 = int_to_ptr.vmem [resolvable:$true] %s372_s27 }
  0x11   : > { %s532_s5 = scalar_lea.vmem (!%p149_p9), %s373_s27, 16  ;;  %s536_s7 = sshll.u32 (!%p149_p9), %s596_s6, 4  ;;  %s537_s7 = int_to_ptr.vmem [resolvable:$false] %s536_s7 }
  0x12   : > { %p533_p11 = scmp.ne.s32.totalorder (!%p149_p9), %s373_s27, %s532_s5  ;;  %p539_p0 = scmp.lt.s32.totalorder (!%p149_p9), %s373_s27, %s537_s7 }
  0x13   : > { %v187_v0 = vld [vmem:[%s730_s2 + $0x20] sm:$0x1]  ;;  %vm197_vm0 = vcmask 1040384   ;;  %v594_v1 = vmov 0.0   ;;  %v186_v2 = vld [vmem:[%s730_s2 + $0x18] sm:$0xff]  ;;  %vm595_vm1 = vmmov 0  }
  0x14   : > { %460 = vmatprep.subr.mxu0 %v594_v1  ;;  %473 = vmatprep.subr.mxu1 %v594_v1  ;;  %v185_v3 = vld [vmem:[%s730_s2 + $0x10] sm:$0xff]  ;;  %s175_s30 = scalar_select %p174_p10, %s638_s16, 1  ;;  %v184_v4 = vld [vmem:[%s730_s2 + $0x8] sm:$0xff]  ;;  %v183_v5 = vld [vmem:[%s730_s2] sm:$0xff]  ;;  %vm193_vm2 = vcmask 269312  }
  0x15   : > { %461 = vmatpush3.msk.msra.mxu0 %vm197_vm0, %v187_v0  ;;  %470 = vmatprep.mubr.msk.f32.mxu0 %vm595_vm1, %v594_v1  ;;  %p534_p12 = pnand %p533_p11, %p655_p5  ;;  %s538_s16 = scalar_lea.vmem %s537_s7, 32 }
  0x16   : > { %462 = vmatprep.subr.mxu0 %v594_v1  ;;  %483 = vmatprep.mubr.msk.f32.mxu1 %vm595_vm1, %v594_v1  ;;  %s176_s8 = scalar_lea.vmem %s728_s0, %s175_s30  ;;  %s486_s9 = smul.u32 40, %s175_s30 }
  0x17   : > { %463 = vmatpush3.msra.mxu0 %v186_v2  ;;  %v182_v6 = vld [vmem:[%s176_s8] sm:$0x1]  ;;  %s370_s30 = scalar_lea.hbm %s731_s3, %s445_s25  ;;  %p535_p13 = pneg %p534_p12 }
  0x18   : > { %464 = vmatprep.subr.mxu0 %v594_v1  ;;  %s181_s20 = scalar_lea.vmem %s729_s1, %s486_s9  ;;  %p540_p1 = scmp.lt.s32.totalorder %s538_s16, %s532_s5 }
  0x19   : > { %465 = vmatpush3.msra.mxu0 %v185_v3  ;;  %v192_v7 = vld [vmem:[%s181_s20 + $0x20] sm:$0x1]  ;;  %v191_v8 = vld [vmem:[%s181_s20 + $0x18] sm:$0xff]  ;;  %v190_v9 = vld [vmem:[%s181_s20 + $0x10] sm:$0xff] }
  0x1a   : > { %466 = vmatprep.subr.mxu0 %v594_v1  ;;  %474 = vmatpush3.msk.msra.mxu1 %vm197_vm0, %v192_v7  ;;  %v189_v10 = vld [vmem:[%s181_s20 + $0x8] sm:$0xff]  ;;  %v188_v11 = vld [vmem:[%s181_s20] sm:$0xff]  ;;  %p541_p2 = por %p540_p1, %p539_p0 }
  0x1b   : > { %467 = vmatpush3.msra.mxu0 %v184_v4  ;;  %475 = vmatprep.subr.mxu1 %v594_v1 }
  0x1c   : > { %468 = vmatprep.subr.mxu0 %v594_v1  ;;  %476 = vmatpush3.msra.mxu1 %v191_v8  ;;  %p542_p3 = pnand %p541_p2, %p535_p13 }
  0x1d   : > { %469 = vmatpush3.msra.mxu0 %v183_v5  ;;  %477 = vmatprep.subr.mxu1 %v594_v1 }
  0x1e   : > { %471 = vmatmul.mubr.msk.f32.vlgmr.msra.gmra.mxu0 %vm193_vm2, %v182_v6  ;;  %478 = vmatpush3.msra.mxu1 %v190_v9 }
  0x1f   : > { %479 = vmatprep.subr.mxu1 %v594_v1 }
  0x20   : > { %480 = vmatpush3.msra.mxu1 %v189_v10 }
  0x21   : > { %481 = vmatprep.subr.mxu1 %v594_v1 }
  0x22   : > { %482 = vmatpush3.msra.mxu1 %v188_v11 }
  0xde   : > { %v267_v12 = vpop.f32.mrf.mxu0 }
  0xdf   : > { %484 = vmatmul.mubr.msk.f32.vlgmr.msra.gmra.mxu1 %vm193_vm2, %v267_v12 }
  0xe0   : > { %v472_v13 = vpop.f32.mrf.mxu0 }
 0x19f   : > { %v343_v14 = vpop.f32.mrf.mxu1 }
 0x1a0   : > { %v347_v15 = vsel %vm197_vm0, %v343_v14, -inf }
 0x1a1   : > { %348 = vmax.xlane.f32.xlu0 %v347_v15  ;;  %v485_v16 = vpop.f32.mrf.mxu1 }
 0x22a   : > { %v349_v17 = vpop.xlane.xlu0 %348 }
 0x22b   : > { %v350_v18 = vsub.f32 %v343_v14, %v349_v17 }
 0x22d   : > { %v351_v19 = vmul.f32 1.442695, %v350_v18 }
 0x22f   : > { %528 = vpow2.f32 %v351_v19 }
 0x23c   : > { %v529_v20 = vpop.eup %528 }
 0x23d   : > { %v353_v21 = vsel %vm197_vm0, %v529_v20, 0.0 }
 0x23e   : > { %354 = vadd.xlane.f32.xlu0 %v353_v21 }
 0x2c7   : > { %v355_v22 = vpop.xlane.xlu0 %354 }
 0x2c8   : > { %530 = vrcp.f32 %v355_v22 }
 0x2d5   : > { %v531_v23 = vpop.eup %530 }
 0x2d6   : > { %v357_v24 = vmul.f32 %v531_v23, %v529_v20 }
 0x2d8   : > { %358 = vst [vmem:[%s173_s26] sm:$0x1] %v357_v24 }
 0x2d9   : > { %545 = shalt.err (!%p542_p3)
}
 0x2da   : > { %s546_s8 = scalar_lea.hbm %s370_s30, 16  ;;  %s550_s11 = scalar_lea.hbm %s731_s3, 32 }
 0x2db   : > { %p547_p4 = scmp.ne.s32.totalorder %s370_s30, %s546_s8  ;;  %p551_p9 = scmp.lt.s32.totalorder %s370_s30, %s731_s3 }
 0x2dc   : > { %p552_p10 = scmp.lt.s32.totalorder %s550_s11, %s546_s8 }
 0x2dd   : > { %p548_p7 = pnand %p547_p4, %p655_p5 }
 0x2de   : > { %p553_p11 = por %p552_p10, %p551_p9 }
 0x2df   : > { %p549_p8 = pneg %p548_p7 }
 0x2e1   : > { %p554_p12 = pnand %p553_p11, %p549_p8 }
 0x2e3   : > { %557 = shalt.err (!%p554_p12)
}
 0x2e4   : > { %487 = dma.vmem_to_hbm [thread:$0]  (%p655_p5), %s373_s27, 16, %s370_s30, %s360_s4  }
 0x2e5 PF: > { %p493_p13 = scmp.ge.s32.totalorder %s592_s15, 2  ;;  %s384_s20 = sand.u32 1, %s580_s12  }
 0x2e6   : > { %s385_s24 = scalar_lea.sflag [#allocation3], %s384_s20 }
 0x2e7   : > { %p490_p0 = pnand %p493_p13, %p659_p6 }
 0x2e9   : > { %p491_p1 = pneg %p490_p0 }
 0x2eb   : > { %575 = dma.done.wait (%p491_p1), %s385_s24, 16  }
 0x2ec   : > { %577 = vsyncadd (%p491_p1), %s385_s24, 4294967280  ;;  %p13_p2 = scmp.ge.s32.totalorder %s642_s18, 4   ;;  %s734_s12 = smov %s584_s13 }
 0x2ed   : > { %s735_s13 = smov %s588_s14  ;;  %s736_s14 = smov %s653_s21 }
 0x2ee   : > { %s737_s15 = smov %s642_s18  ;;  %15 = sbr.rel (!%p13_p2) target bundleno = 3 (0x3), region = 70 }
 0x2f3   :  { %389 = vsyncpa [#allocation3], 1 }
 0x2f4   :  { %391 = vsyncpa [#allocation3 + $0x1], 1 }

</bundles_post_ra>
